<compile_context>
chip_gen: v6e
topology: v6e:2x2x1
jax: 0.10.0
libtpu: 0.0.40
codegen_flags: <defaults>
</compile_context>

<pallas_src>
import math

import jax
import jax.numpy as jnp
import numpy as np
from jax.experimental import pallas as pl
from jax.experimental.pallas import tpu as pltpu


def _pe_add_kernel(x_ref, pe_ref, o_ref):
    # x_ref/o_ref: (TB, C, TL) VMEM tiles; pe_ref: (C, TL) fp32, broadcast over batch.
    o_ref[...] = (x_ref[...].astype(jnp.float32) + pe_ref[...]).astype(o_ref.dtype)


def _compute_pe(d_model, max_len):
    """(C, L) sinusoidal table in fp32, computed once in plain XLA (mirrors the module)."""
    position = jnp.arange(max_len, dtype=jnp.float32)[None, :]                  # (1, L)
    div_term = jnp.exp(jnp.arange(0, d_model, 2, dtype=jnp.float32)
                       * (-math.log(max_len) / d_model))[:, None]               # (ceil(d/2), 1)
    arg = div_term * position                                                   # (ceil(d/2), L)
    pe = jnp.zeros((d_model, max_len), jnp.float32)
    pe = pe.at[0::2, :].set(jnp.sin(arg))
    pe = pe.at[1::2, :].set(jnp.cos(arg)[: d_model // 2])                       # odd-d_model safe
    return pe


def _choose_tiles(B, C, L, x_itemsize, out_itemsize, target_bytes=2 << 20):
    """Pick (batch_tile, lane_tile).

    Lane tile is either the full L (small slabs) or a multiple of 128 (ragged last
    block handled by pl.cdiv), sized so x+out blocks stay around `target_bytes`.
    Batch tiles are fused only while the combined x+out block stays <= ~2x target,
    and never so far that the grid collapses to a single step (v7x megacore).
    """
    io_itemsize = x_itemsize + out_itemsize
    # --- lane tile ---
    if C * L * max(x_itemsize, out_itemsize) <= target_bytes:
        tl = L                                          # full lane extent (always legal)
    else:
        tl = 128
        for cand in (2048, 1024, 512, 256, 128):
            if C * cand * max(x_itemsize, out_itemsize) <= target_bytes:
                tl = cand
                break
        if tl > L:
            tl = L
    nl = pl.cdiv(L, tl)

    # --- batch tile ---
    per_batch_block = C * tl * io_itemsize              # one batch row of x + out
    tb = int(max(1, min(B, (2 * target_bytes) // max(per_batch_block, 1))))
    # Keep >= 2 total grid steps when the problem allows it (use both TCs on v7x).
    if nl * pl.cdiv(B, tb) < 2 and B >= 2:
        tb = max(1, B // 2)
    return tb, tl


def positional_encoding(x, d_model=64):
    """x: (B, C, L) float array with C == d_model. Returns x + sinusoidal PE."""
    B, C, L = x.shape
    assert d_model == C, "broadcast add requires channel dim == d_model"

    pe = _compute_pe(d_model, L)                          # (C, L) fp32, once, outside kernel

    out_dtype = jnp.result_type(x.dtype, jnp.float32)     # PyTorch promotes x + fp32 buffer
    x_itemsize = jnp.dtype(x.dtype).itemsize
    out_itemsize = jnp.dtype(out_dtype).itemsize

    tb, tl = _choose_tiles(B, C, L, x_itemsize, out_itemsize)
    nl = pl.cdiv(L, tl)
    nb = pl.cdiv(B, tb)
    # Grid ordered (lane, batch): batch is innermost, so the pe block index (0, l)
    # is constant across consecutive steps -> pe is NOT re-DMA'd per batch block.
    grid = (nl, nb)

    cost = pl.CostEstimate(
        flops=B * C * L,                                  # just the adds
        transcendentals=0,
        bytes_accessed=B * C * L * (x_itemsize + out_itemsize) + nl * C * tl * 4,
    )

    return pl.pallas_call(
        _pe_add_kernel,
        out_shape=jax.ShapeDtypeStruct((B, C, L), out_dtype),
        grid=grid,
        in_specs=[
            pl.BlockSpec((tb, C, tl), lambda l, b: (b, 0, l)),
            pl.BlockSpec((C, tl), lambda l, b: (0, l)),   # revisited across inner batch axis
        ],
        out_specs=pl.BlockSpec((tb, C, tl), lambda l, b: (b, 0, l)),
        compiler_params=pltpu.CompilerParams(
            dimension_semantics=("parallel", "parallel"),
            vmem_limit_bytes=32 << 20,                    # explicit: safe on v5e/v6e/v7x
        ),
        cost_estimate=cost,
    )(x, pe)


def _reference(x, d_model=64):
    # Pure-JAX reference mirroring the PyTorch forward exactly.
    _, _, max_len = x.shape
    position = jnp.arange(max_len, dtype=jnp.float32)[None, :]                  # (1, L)
    div_term = jnp.exp(jnp.arange(0, d_model, 2, dtype=jnp.float32)
                       * (-math.log(max_len) / d_model))[:, None]               # (d/2, 1)
    arg = div_term @ position                                                   # (d/2, L)
    pe = jnp.zeros((1, d_model, max_len), jnp.float32)
    pe = pe.at[0, 0::2, :].set(jnp.sin(arg))
    pe = pe.at[0, 1::2, :].set(jnp.cos(arg)[: d_model // 2])
    return x.astype(jnp.float32) + pe


if __name__ == "__main__":
    key = jax.random.PRNGKey(0)
    B, d_model, seq = 2, 64, 200          # seq not a multiple of 128 on purpose
    x = jax.random.normal(key, (B, d_model, seq), dtype=jnp.float32)

    out = positional_encoding(x, d_model=d_model)
    out = jax.block_until_ready(out)

    ref = jax.block_until_ready(_reference(x, d_model=d_model))
    np.testing.assert_allclose(np.asarray(out), np.asarray(ref), rtol=1e-5, atol=1e-5)

    print("KERNEL_OK")
</pallas_src>

<mosaic_0001>
module attributes {stable_mosaic.version = 11 : i64} {
  func.func @_pe_add_kernel(%arg0: i32, %arg1: i32, %arg2: memref<1x64x200xf32, #tpu.memory_space<vmem>>, %arg3: memref<64x200xf32, #tpu.memory_space<vmem>>, %arg4: memref<1x64x200xf32, #tpu.memory_space<vmem>>) attributes {dimension_semantics = [#tpu.dimension_semantics<parallel>, #tpu.dimension_semantics<parallel>], iteration_bounds = array<i64: 1, 2>, scalar_prefetch = 0 : i64, scratch_operands = 0 : i64, tpu.core_type = #tpu.core_type<tc>, window_params = [{transform_indices = @transform_0, window_bounds = array<i64: 1, 64, 200>}, {transform_indices = @transform_1, window_bounds = array<i64: 64, 200>}, {transform_indices = @transform_2, window_bounds = array<i64: 1, 64, 200>}]} {
    %c0 = arith.constant 0 : index
    %c0_0 = arith.constant 0 : index
    %c0_1 = arith.constant 0 : index
    %0 = vector.load %arg2[%c0, %c0_0, %c0_1] : memref<1x64x200xf32, #tpu.memory_space<vmem>>, vector<1x64x200xf32>
    %c0_2 = arith.constant 0 : index
    %c0_3 = arith.constant 0 : index
    %1 = vector.load %arg3[%c0_2, %c0_3] : memref<64x200xf32, #tpu.memory_space<vmem>>, vector<64x200xf32>
    %2 = vector.shape_cast %1 : vector<64x200xf32> to vector<1x64x200xf32>
    %3 = arith.addf %0, %2 : vector<1x64x200xf32>
    %c0_4 = arith.constant 0 : index
    %c0_5 = arith.constant 0 : index
    %c0_6 = arith.constant 0 : index
    %4 = vector.load %arg4[%c0_4, %c0_5, %c0_6] : memref<1x64x200xf32, #tpu.memory_space<vmem>>, vector<1x64x200xf32>
    tpu.vector_store %arg4[%c0_4, %c0_5, %c0_6], %3 {strides = array<i32>} : memref<1x64x200xf32, #tpu.memory_space<vmem>>, vector<1x64x200xf32>,
    return
  }
  func.func @transform_0(%arg0: i32, %arg1: i32) -> (i32, i32, i32) {
    %c0_i32 = arith.constant 0 : i32
    %c0_i32_0 = arith.constant 0 : i32
    return %arg1, %c0_i32, %arg0 : i32, i32, i32
  }
  func.func @transform_1(%arg0: i32, %arg1: i32) -> (i32, i32) {
    %c0_i32 = arith.constant 0 : i32
    %c0_i32_0 = arith.constant 0 : i32
    return %c0_i32, %arg0 : i32, i32
  }
  func.func @transform_2(%arg0: i32, %arg1: i32) -> (i32, i32, i32) {
    %c0_i32 = arith.constant 0 : i32
    %c0_i32_0 = arith.constant 0 : i32
    return %arg1, %c0_i32, %arg0 : i32, i32, i32
  }
}

</mosaic_0001>

<bundles_post_ra>
// kernel: tpu_custom_call.1
= control target key start
LH: loop header
LB: loop body
LE: loop exit
PB: predicated region body
PF: predicated region fallthrough
CT: control target
= control target key end

     0   :  { %7 = vsyncpa [#allocation3], 0  ;;  %s876_s0 = inlined_call_operand.hbm [shape: f32[2,64,200], index: 0, kind: input, shape index: {}]   ;;  %s877_s1 = inlined_call_operand.hbm [shape: f32[64,200], index: 1, kind: input, shape index: {}]   ;;  %s878_s2 = inlined_call_operand.hbm [shape: f32[2,64,200], index: 2, kind: output, shape index: {}]  }
   0x1   :  { %9 = vsyncpa [#allocation3 + $0x1], 0 }
   0x2   :  { %10 = vsyncpa [#allocation6], 0 }
   0x3   :  { %11 = vsyncpa [#allocation4], 0 }
   0x4   :  { %13 = vsyncpa [#allocation4 + $0x1], 0  ;;  %s644_s9 = smov 0   ;;  %s646_s10 = smov 0  }
   0x5   :  { %s648_s11 = smov 0   ;;  %s650_s12 = smov 0  }
   0x6   :  { %s652_s13 = smov 0   ;;  %s654_s14 = smov 0  }
   0x7 LB: > { %s386_s15 = sadd.s32 4294967295, %s620_s14   ;;  %s387_s16 = sadd.s32 4294967294, %s620_s14   ;;  %s620_s14 = sphi %s654_s14, %s19_s14   ;;  %s616_s13 = sphi %s652_s13, %s898_s13   ;;  %s612_s12 = sphi %s650_s12, %s897_s12   ;;  %s608_s11 = sphi %s648_s11, %s896_s11   ;;  %s604_s10 = sphi %s646_s10, %s895_s10   ;;  %s600_s9 = sphi %s644_s9, %s894_s9  }
   0x8   : > { %p53_p0 = scmp.ne.s32.totalorder %s604_s10, %s600_s9  ;;  %p678_p1 = scmp.eq.s32.totalorder %s386_s15, 0 }
   0x9   : > { %p682_p2 = scmp.eq.s32.totalorder %s386_s15, 1  ;;  %p111_p3 = scmp.eq.s32.totalorder %s387_s16, 1 }
   0xa   : > { %p688_p4 = por %p678_p1, %p53_p0  ;;  %p388_p5 = scmp.ge.s32.totalorder %s620_s14, 1 }
   0xb   : > { %p693_p6 = por %p111_p3, %p53_p0  ;;  %p118_p7 = scmp.lt.s32.totalorder %s620_s14, 3 }
   0xc   : > { %s883_s19 = scalar_select %p688_p4, 1, 0 }
   0xd   : > { %s884_s20 = scalar_select %p693_p6, 1, 0 }
   0xe   : > { %p698_p8 = pnand %p388_p5, %p118_p7  ;;  %s622_s22 = smov [#allocation5]  }
   0xf   : > { %s133_s23 = sshll.u32 %s622_s22, 4  ;;  %s28_s25 = sadd.s32 1, %s616_s13  ;;  %s134_s23 = int_to_ptr.vmem [resolvable:$true] %s133_s23 }
  0x10   : > { %p413_p9 = pneg %p698_p8  ;;  %s493_s26 = scalar_lea.vmem %s134_s23, 2048 }
  0x11   : > { %p494_p13 = scmp.ne.s32.totalorder %s134_s23, %s493_s26  ;;  %p501_p5 = scmp.lt.s32.totalorder %s134_s23, %s134_s23 }
  0x12   : > { %p707_p11 = pnand %p413_p9, %p678_p1  ;;  %p502_p7 = scmp.lt.s32.totalorder %s493_s26, %s493_s26 }
  0x14   : > { %p484_p12 = pneg %p707_p11  ;;  %p503_p6 = por %p502_p7, %p501_p5 }
  0x16   : > { %p496_p0 = pnand %p494_p13, %p484_p12 }
  0x18   : > { %p497_p3 = pneg %p496_p0 }
  0x1a   : > { %p504_p4 = pnand %p503_p6, %p497_p3 }
  0x1c   : > { %507 = shalt.err (!%p504_p4)
}
  0x1d   : > { %s880_s27 = smov 256   ;;  %s624_s28 = smov 16  }
  0x1e   : > { %416 = dma.hbm_to_vmem [thread:$0]  (!%p707_p11), %s877_s1, 2048, %s134_s23, [#allocation6], %s880_s27, %s880_s27, %s624_s28  }
  0x1f   : > { %p29_p4 = scmp.ge.s32.totalorder %s28_s25, 2  ;;  %s40_s3 = sadd.s32 1, %s608_s11 }
  0x20   : > { %p47_p6 = scmp.ne.s32.totalorder %s608_s11, %s604_s10  ;;  %p48_p9 = scmp.eq.s32.totalorder %s620_s14, 0 }
  0x21   : > { %s900_s25 = smov (%p29_p4, %s28_s25), 0  ;;  %p426_p0 = scmp.lt.s32.totalorder %s620_s14, 2 }
  0x22   : > { %p728_p12 = por %p48_p9, %p47_p6  ;;  %p734_p13 = por %p682_p2, %p47_p6 }
  0x23   : > { %s35_s6 = ssub.s32 %s616_s13, %s900_s25  ;;  %s147_s7 = sand.u32 1, %s608_s11  }
  0x24   : > { %p38_p11 = scmp.eq.s32.totalorder %s35_s6, 0  ;;  %s391_s8 = sshll.u32 %s147_s7, 7 }
  0x25   : > { %s403_s16 = sshll.u32 %s616_s13, 11  ;;  %s151_s26 = scalar_lea.vmem [#allocation2], %s391_s8 }
  0x26   : > { %s743_s15 = scalar_select %p38_p11, %s608_s11, %s40_s3  }
  0x27   : > { %s159_s24 = scalar_lea.hbm %s876_s0, %s403_s16  ;;  %s160_s29 = sshll.u32 %s151_s26, 4  ;;  %s161_s29 = int_to_ptr.vmem [resolvable:$true] %s160_s29 }
  0x28   : > { %p751_p2 = pnand %p426_p0, %p728_p12  ;;  %s148_s30 = scalar_lea.sflag [#allocation3], %s147_s7 }
  0x29   : > { %s521_s6 = scalar_lea.vmem %s161_s29, 2048  ;;  %s625_s3 = smov [#allocation2]  }
  0x2a   : > { %p510_p3 = pneg %p751_p2  ;;  %p522_p5 = scmp.ne.s32.totalorder %s161_s29, %s521_s6 }
  0x2b   : > { %s526_s27 = sshll.u32 %s625_s3, 4  ;;  %s527_s27 = int_to_ptr.vmem [resolvable:$false] %s526_s27 }
  0x2c   : > { %p524_p7 = pnand %p522_p5, %p510_p3  ;;  %s528_s16 = scalar_lea.vmem %s527_s27, 4096 }
  0x2d   : > { %p529_p6 = scmp.lt.s32.totalorder %s161_s29, %s527_s27  ;;  %p530_p9 = scmp.lt.s32.totalorder %s528_s16, %s521_s6 }
  0x2e   : > { %p525_p4 = pneg %p524_p7 }
  0x2f   : > { %p531_p11 = por %p530_p9, %p529_p6 }
  0x31   : > { %p532_p10 = pnand %p531_p11, %p525_p4 }
  0x33   : > { %535 = shalt.err (!%p532_p10)
}
  0x34   : > { %s890_s4 = smov 256   ;;  %172 = sbr.rel (%p698_p8) target bundleno = 89 (0x59), region = 28 }
  0x35   : > { %420 = dma.hbm_to_vmem [thread:$0]  (!%p751_p2), %s159_s24, 2048, %s161_s29, %s148_s30, %s890_s4, %s890_s4, %s624_s28  }
  0x36   : > { %s765_s7 = sand.u32 (!%p698_p8), 1, %s604_s10   ;;  %p891_p10 = scmp.ne.s32.totalorder (!%p698_p8), %s883_s19, 0 }
  0x37   : > { %s395_s27 = sshll.u32 (!%p698_p8), %s765_s7, 7  ;;  %s175_s8 = scalar_lea.sflag (!%p698_p8), [#allocation3], %s765_s7 }
  0x38   : > { %s769_s22 = scalar_lea.vmem (!%p698_p8), [#allocation2], %s395_s27 }
  0x39   : > { %587 = dma.done.wait (%p891_p10), %s175_s8, 2048  }
  0x3a   : > { %589 = vsyncadd (%p891_p10), %s175_s8, 4294965248 }
  0x3b   : > { %591 = dma.done.wait (%p678_p1), [#allocation6], 2048  }
  0x3c   : > { %593 = vsyncadd (%p678_p1), [#allocation6], 4294965248  ;;  %v206_v0 = vld [vmem:[%s769_s22] sm:$0xff]  ;;  %v207_v2 = vld [vmem:[%s769_s22 + $0x8] sm:$0xff]  ;;  %vm255_vm0 = vcmask 588800   ;;  %s784_s17 = scalar_lea.vmem [#allocation7], %s395_s27 }
  0x3d   : > { %v222_v1 = vld [vmem:[#allocation5] sm:$0xff]  ;;  %v223_v4 = vld [vmem:[#allocation5 + $0x8] sm:$0xff]  ;;  %v208_v5 = vld [vmem:[%s769_s22 + $0x10] sm:$0xff]  ;;  %s404_s19 = sshll.u32 %s612_s12, 11  ;;  %s287_s21 = sshll.u32 %s784_s17, 4  ;;  %s822_s21 = int_to_ptr.vmem [resolvable:$true] %s287_s21 }
  0x3e   : > { %v238_v3 = vadd.f32 %v222_v1, %v206_v0  ;;  %v224_v6 = vld [vmem:[#allocation5 + $0x10] sm:$0xff]  ;;  %v239_v7 = vadd.f32 %v223_v4, %v207_v2  ;;  %v209_v9 = vld [vmem:[%s769_s22 + $0x18] sm:$0xff]  ;;  %v210_v11 = vld [vmem:[%s769_s22 + $0x20] sm:$0xff]  ;;  %s820_s23 = scalar_lea.hbm %s878_s2, %s404_s19  ;;  %s272_s24 = scalar_lea.sflag [#allocation4], %s765_s7 }
  0x3f   : > { %v240_v8 = vadd.f32 %v224_v6, %v208_v5  ;;  %v225_v10 = vld [vmem:[#allocation5 + $0x18] sm:$0xff]  ;;  %v226_v13 = vld [vmem:[#allocation5 + $0x20] sm:$0xff]  ;;  %v211_v14 = vld [vmem:[%s769_s22 + $0x28] sm:$0xff]  ;;  %s536_s26 = scalar_lea.vmem %s822_s21, 2048  ;;  %s626_s29 = smov [#allocation7]  }
  0x40   : > { %254 = vst [vmem:[%s784_s17] sm:$0xff] %v238_v3  ;;  %v241_v12 = vadd.f32 %v225_v10, %v209_v9  ;;  %v227_v15 = vld [vmem:[#allocation5 + $0x28] sm:$0xff]  ;;  %256 = vst.msk [vmem:[%s784_s17 + $0x8] sm:$0xff] %vm255_vm0, %v239_v7  ;;  %v242_v16 = vadd.f32 %v226_v13, %v210_v11  ;;  %v212_v18 = vld [vmem:[%s769_s22 + $0x30] sm:$0xff]  ;;  %p537_p1 = scmp.ne.s32.totalorder %s822_s21, %s536_s26  ;;  %s540_s18 = sshll.u32 %s626_s29, 4  ;;  %s541_s18 = int_to_ptr.vmem [resolvable:$false] %s540_s18 }
  0x41   : > { %257 = vst [vmem:[%s784_s17 + $0x10] sm:$0xff] %v240_v8  ;;  %v243_v17 = vadd.f32 %v227_v15, %v211_v14  ;;  %v228_v19 = vld [vmem:[#allocation5 + $0x30] sm:$0xff]  ;;  %v213_v20 = vld [vmem:[%s769_s22 + $0x38] sm:$0xff]  ;;  %v214_v23 = vld [vmem:[%s769_s22 + $0x40] sm:$0xff]  ;;  %s542_s30 = scalar_lea.vmem %s541_s18, 4096  ;;  %p543_p0 = scmp.lt.s32.totalorder %s822_s21, %s541_s18 }
  0x42   : > { %258 = vst.msk [vmem:[%s784_s17 + $0x18] sm:$0xff] %vm255_vm0, %v241_v12  ;;  %v244_v21 = vadd.f32 %v228_v19, %v212_v18  ;;  %v229_v22 = vld [vmem:[#allocation5 + $0x38] sm:$0xff]  ;;  %v230_v24 = vld [vmem:[#allocation5 + $0x40] sm:$0xff]  ;;  %259 = vst [vmem:[%s784_s17 + $0x20] sm:$0xff] %v242_v16  ;;  %p538_p8 = pnand %p537_p1, %p734_p13  ;;  %p544_p2 = scmp.lt.s32.totalorder %s542_s30, %s536_s26 }
  0x43   : > { %260 = vst.msk [vmem:[%s784_s17 + $0x28] sm:$0xff] %vm255_vm0, %v243_v17  ;;  %v245_v25 = vadd.f32 %v229_v22, %v213_v20  ;;  %v246_v26 = vadd.f32 %v230_v24, %v214_v23  ;;  %v215_v27 = vld [vmem:[%s769_s22 + $0x48] sm:$0xff]  ;;  %v216_v29 = vld [vmem:[%s769_s22 + $0x50] sm:$0xff]  ;;  %v217_v32 = vld [vmem:[%s769_s22 + $0x58] sm:$0xff] }
  0x44   : > { %v231_v28 = vld [vmem:[#allocation5 + $0x48] sm:$0xff]  ;;  %261 = vst [vmem:[%s784_s17 + $0x30] sm:$0xff] %v244_v21  ;;  %v232_v31 = vld [vmem:[#allocation5 + $0x50] sm:$0xff]  ;;  %v233_v33 = vld [vmem:[#allocation5 + $0x58] sm:$0xff]  ;;  %p539_p12 = pneg %p538_p8  ;;  %p545_p3 = por %p544_p2, %p543_p0 }
  0x45   : > { %v247_v30 = vadd.f32 %v231_v28, %v215_v27  ;;  %262 = vst.msk [vmem:[%s784_s17 + $0x38] sm:$0xff] %vm255_vm0, %v245_v25  ;;  %263 = vst [vmem:[%s784_s17 + $0x40] sm:$0xff] %v246_v26  ;;  %v248_v34 = vadd.f32 %v232_v31, %v216_v29  ;;  %v249_v35 = vadd.f32 %v233_v33, %v217_v32  ;;  %v218_v36 = vld [vmem:[%s769_s22 + $0x60] sm:$0xff]  ;;  %v219_v38 = vld [vmem:[%s769_s22 + $0x68] sm:$0xff] }
  0x46   : > { %v234_v37 = vld [vmem:[#allocation5 + $0x60] sm:$0xff]  ;;  %v235_v40 = vld [vmem:[#allocation5 + $0x68] sm:$0xff]  ;;  %v220_v41 = vld [vmem:[%s769_s22 + $0x70] sm:$0xff]  ;;  %p546_p5 = pnand %p545_p3, %p539_p12 }
  0x47   : > { %264 = vst.msk [vmem:[%s784_s17 + $0x48] sm:$0xff] %vm255_vm0, %v247_v30  ;;  %v250_v39 = vadd.f32 %v234_v37, %v218_v36  ;;  %v236_v42 = vld [vmem:[#allocation5 + $0x70] sm:$0xff]  ;;  %265 = vst [vmem:[%s784_s17 + $0x50] sm:$0xff] %v248_v34  ;;  %v251_v43 = vadd.f32 %v235_v40, %v219_v38  ;;  %v221_v45 = vld [vmem:[%s769_s22 + $0x78] sm:$0xff] }
  0x48   : > { %266 = vst.msk [vmem:[%s784_s17 + $0x58] sm:$0xff] %vm255_vm0, %v249_v35  ;;  %v252_v44 = vadd.f32 %v236_v42, %v220_v41  ;;  %v237_v46 = vld [vmem:[#allocation5 + $0x78] sm:$0xff] }
  0x49   : > { %267 = vst [vmem:[%s784_s17 + $0x60] sm:$0xff] %v250_v39  ;;  %v253_v47 = vadd.f32 %v237_v46, %v221_v45  ;;  %268 = vst.msk [vmem:[%s784_s17 + $0x68] sm:$0xff] %vm255_vm0, %v251_v43 }
  0x4a   : > { %269 = vst [vmem:[%s784_s17 + $0x70] sm:$0xff] %v252_v44 }
  0x4b   : > { %270 = vst.msk [vmem:[%s784_s17 + $0x78] sm:$0xff] %vm255_vm0, %v253_v47 }
  0x4c   : > { %549 = shalt.err (!%p546_p5)
}
  0x4d   : > { %s550_s6 = scalar_lea.hbm %s820_s23, 2048  ;;  %s554_s4 = scalar_lea.hbm %s878_s2, 4096 }
  0x4e   : > { %p551_p7 = scmp.ne.s32.totalorder %s820_s23, %s550_s6  ;;  %p555_p9 = scmp.lt.s32.totalorder %s820_s23, %s878_s2 }
  0x4f   : > { %p556_p11 = scmp.lt.s32.totalorder %s554_s4, %s550_s6 }
  0x50   : > { %p552_p4 = pnand %p551_p7, %p734_p13 }
  0x51   : > { %p557_p10 = por %p556_p11, %p555_p9 }
  0x52   : > { %p553_p6 = pneg %p552_p4 }
  0x54   : > { %p558_p1 = pnand %p557_p10, %p553_p6 }
  0x56   : > { %561 = shalt.err (!%p558_p1)
}
  0x57   : > { %s627_s22 = smov 256   ;;  %s628_s17 = smov 16  }
  0x58   : > { %411 = dma.vmem_to_hbm [thread:$0]  (%p734_p13), %s822_s21, 2048, %s820_s23, %s272_s24, %s627_s22, %s627_s22, %s628_s17  }
  0x59 PF: > { %s302_s19 = sand.u32 1, %s600_s9   ;;  %p892_p8 = scmp.ne.s32.totalorder %s884_s20, 0 }
  0x5a   : > { %p893_p12 = scmp.ge.s32.totalorder %s620_s14, 2  ;;  %s303_s12 = scalar_lea.sflag [#allocation4], %s302_s19 }
  0x5c   : > { %p422_p0 = pnand %p893_p12, %p892_p8 }
  0x5e   : > { %p423_p2 = pneg %p422_p0 }
  0x60   : > { %595 = dma.done.wait (%p423_p2), %s303_s12, 2048  }
  0x61   : > { %597 = vsyncadd (%p423_p2), %s303_s12, 4294965248  ;;  %s19_s14 = sadd.s32 1, %s620_s14   ;;  %s894_s9 = smov %s604_s10 }
  0x62   : > { %p16_p3 = scmp.ge.s32.totalorder %s19_s14, 4   ;;  %s895_s10 = smov %s608_s11 }
  0x63   : > { %s896_s11 = smov %s743_s15  ;;  %s897_s12 = smov %s616_s13 }
  0x64   : > { %s898_s13 = smov %s900_s25  ;;  %18 = sbr.rel (!%p16_p3) target bundleno = 7 (0x7), region = 78 }
  0x69   :  { %308 = vsyncpa [#allocation3], 1 }
  0x6a   :  { %310 = vsyncpa [#allocation3 + $0x1], 1 }
  0x6b   :  { %311 = vsyncpa [#allocation6], 1 }
  0x6c   :  { %312 = vsyncpa [#allocation4], 1 }
  0x6d   :  { %314 = vsyncpa [#allocation4 + $0x1], 1 }

</bundles_post_ra>
